<compile_context>
chip_gen: v5e
topology: v5e:2x2
jax: 0.10.0
libtpu: 0.0.40
codegen_flags: <defaults>
</compile_context>

<pallas_src>
import jax
import jax.numpy as jnp
from jax.experimental import pallas as pl
from jax.experimental.pallas import tpu as pltpu


def _round_up(x, m):
    return (x + m - 1) // m * m


def _item_tower_kernel(cls_ref, w_ref, b_ref, out_ref):
    """Fused: embedding = L2_normalize(cls @ W + b) for one batch tile."""
    x = cls_ref[...]                                   # [TB, D_in_p] native dtype
    w = w_ref[...]                                     # [D_in_p, D_out_p] native dtype
    b = b_ref[...].astype(jnp.float32)                 # [1, D_out_p]
    # MXU matmul, f32 accumulation; operands stay in their input dtype.
    h = jnp.dot(x, w, preferred_element_type=jnp.float32) + b   # [TB, D_out_p]
    # L2 normalization along the embedding dim (VPU reduce + EUP rsqrt).
    sq = jnp.sum(h * h, axis=-1, keepdims=True)                  # [TB, 1]
    inv_norm = jax.lax.rsqrt(sq + 1e-12)
    out_ref[...] = (h * inv_norm).astype(out_ref.dtype)


def item_tower_forward(cls_emb, weight, bias, *, max_tile_b=256):
    """cls_emb: [B, D_in]; weight: [D_in, D_out]; bias: [D_out] -> [B, D_out]."""
    B, D_in = cls_emb.shape
    D_in_w, D_out = weight.shape
    assert D_in == D_in_w, "weight shape mismatch"

    # Lane-dense padding (multiples of 128 on the last dims); batch tile
    # is a multiple of 8 sublanes.  Conservative TB keeps double-buffered
    # cls/out tiles + resident W well under the scoped VMEM limit on all
    # of v5e / v6e / v7x for typical transformer dims.
    d_in_p = _round_up(D_in, 128)
    d_out_p = _round_up(D_out, 128)
    tb = min(max_tile_b, _round_up(B, 8))
    b_p = _round_up(B, tb)

    cls_p = jnp.pad(cls_emb, ((0, b_p - B), (0, d_in_p - D_in)))
    w_p = jnp.pad(weight, ((0, d_in_p - D_in), (0, d_out_p - D_out)))
    bias_p = jnp.pad(bias.reshape(1, D_out), ((0, 0), (0, d_out_p - D_out)))

    grid = (b_p // tb,)

    itemsize = jnp.dtype(cls_emb.dtype).itemsize
    cost = pl.CostEstimate(
        flops=2 * b_p * d_in_p * d_out_p,
        transcendentals=b_p,  # one rsqrt per row
        bytes_accessed=(b_p * d_in_p * itemsize
                        + d_in_p * d_out_p * jnp.dtype(weight.dtype).itemsize
                        + d_out_p * 4
                        + b_p * d_out_p * itemsize),
    )

    out_p = pl.pallas_call(
        _item_tower_kernel,
        out_shape=jax.ShapeDtypeStruct((b_p, d_out_p), cls_emb.dtype),
        grid=grid,
        in_specs=[
            # cls tile streams over the batch axis.
            pl.BlockSpec((tb, d_in_p), lambda i: (i, 0)),
            # Weight / bias: constant index_map -> stays resident in VMEM.
            pl.BlockSpec((d_in_p, d_out_p), lambda i: (0, 0)),
            pl.BlockSpec((1, d_out_p), lambda i: (0, 0)),
        ],
        out_specs=pl.BlockSpec((tb, d_out_p), lambda i: (i, 0)),
        compiler_params=pltpu.CompilerParams(
            dimension_semantics=("parallel",),
        ),
        cost_estimate=cost,
    )(cls_p, w_p, bias_p)

    return out_p[:B, :D_out]


def _reference(cls_emb, weight, bias):
    h = cls_emb.astype(jnp.float32) @ weight.astype(jnp.float32) + bias.astype(jnp.float32)
    # NOTE: epsilon semantics are h * rsqrt(sum(h^2) + 1e-12); torch's
    # F.normalize uses x / max(||x||, eps) -- differs only for near-zero rows.
    return h / jnp.sqrt(jnp.sum(h * h, axis=-1, keepdims=True) + 1e-12)


if __name__ == "__main__":
    key = jax.random.PRNGKey(0)
    k_cls, k_w, k_b = jax.random.split(key, 3)

    # Small synthetic shapes; non-128 dims exercise the padding path.
    B, D_in, D_out = 8, 64, 48

    cls_emb = jax.random.normal(k_cls, (B, D_in), dtype=jnp.float32)
    # Deterministic parameter init (synthetic; no checkpoint load).
    weight = jax.random.normal(k_w, (D_in, D_out), dtype=jnp.float32) * 0.02
    bias = jax.random.normal(k_b, (D_out,), dtype=jnp.float32) * 0.02

    out = item_tower_forward(cls_emb, weight, bias)
    out = jax.block_until_ready(out)

    ref = _reference(cls_emb, weight, bias)
    assert out.shape == (B, D_out)
    assert jnp.allclose(out, ref, atol=1e-5, rtol=1e-5), "mismatch vs reference"

    print("KERNEL_OK")
</pallas_src>

<mosaic_0001>
module attributes {stable_mosaic.version = 11 : i64} {
  func.func @_item_tower_kernel(%arg0: i32, %arg1: memref<8x128xf32, #tpu.memory_space<vmem>>, %arg2: memref<128x128xf32, #tpu.memory_space<vmem>>, %arg3: memref<1x128xf32, #tpu.memory_space<vmem>>, %arg4: memref<8x128xf32, #tpu.memory_space<vmem>>) attributes {dimension_semantics = [#tpu.dimension_semantics<parallel>], iteration_bounds = array<i64: 1>, scalar_prefetch = 0 : i64, scratch_operands = 0 : i64, tpu.core_type = #tpu.core_type<tc>, window_params = [{transform_indices = @transform_0, window_bounds = array<i64: 8, 128>}, {pipeline_mode = #tpu.pipeline_mode<synchronous>, transform_indices = @transform_1, window_bounds = array<i64: 128, 128>}, {pipeline_mode = #tpu.pipeline_mode<synchronous>, transform_indices = @transform_2, window_bounds = array<i64: 1, 128>}, {transform_indices = @transform_3, window_bounds = array<i64: 8, 128>}]} {
    %c0 = arith.constant 0 : index
    %c0_0 = arith.constant 0 : index
    %0 = vector.load %arg1[%c0, %c0_0] : memref<8x128xf32, #tpu.memory_space<vmem>>, vector<8x128xf32>
    %c0_1 = arith.constant 0 : index
    %c0_2 = arith.constant 0 : index
    %1 = vector.load %arg2[%c0_1, %c0_2] : memref<128x128xf32, #tpu.memory_space<vmem>>, vector<128x128xf32>
    %c0_3 = arith.constant 0 : index
    %c0_4 = arith.constant 0 : index
    %2 = vector.load %arg3[%c0_3, %c0_4] : memref<1x128xf32, #tpu.memory_space<vmem>>, vector<1x128xf32>
    %cst = arith.constant dense<0.000000e+00> : vector<8x128xf32>
    %3 = tpu.matmul %0, %1, %cst {dimension_numbers = #tpu.dot_dimension_numbers<[1], [0], [0], [1], [0, 0, 1, 1], [], []>} : vector<8x128xf32>, vector<128x128xf32>, vector<8x128xf32> -> vector<8x128xf32>
    %4 = vector.broadcast %2 : vector<1x128xf32> to vector<8x128xf32>
    %5 = arith.addf %3, %4 : vector<8x128xf32>
    %6 = arith.mulf %5, %5 : vector<8x128xf32>
    %cst_5 = arith.constant dense<0.000000e+00> : vector<8xf32>
    %7 = vector.multi_reduction <add>, %6, %cst_5 [1] : vector<8x128xf32> to vector<8xf32>
    %8 = vector.shape_cast %7 : vector<8xf32> to vector<8x1xf32>
    %cst_6 = arith.constant 9.99999996E-13 : f32
    %9 = vector.broadcast %cst_6 : f32 to vector<8x1xf32>
    %10 = arith.addf %8, %9 : vector<8x1xf32>
    %11 = math.rsqrt %10 : vector<8x1xf32>
    %12 = vector.broadcast %11 : vector<8x1xf32> to vector<8x128xf32>
    %13 = arith.mulf %5, %12 : vector<8x128xf32>
    %c0_7 = arith.constant 0 : index
    %c0_8 = arith.constant 0 : index
    %14 = vector.load %arg4[%c0_7, %c0_8] : memref<8x128xf32, #tpu.memory_space<vmem>>, vector<8x128xf32>
    tpu.vector_store %arg4[%c0_7, %c0_8], %13 {strides = array<i32>} : memref<8x128xf32, #tpu.memory_space<vmem>>, vector<8x128xf32>,
    return
  }
  func.func @transform_0(%arg0: i32) -> (i32, i32) {
    %c0_i32 = arith.constant 0 : i32
    %c0_i32_0 = arith.constant 0 : i32
    return %arg0, %c0_i32 : i32, i32
  }
  func.func @transform_1(%arg0: i32) -> (i32, i32) {
    %c0_i32 = arith.constant 0 : i32
    %c0_i32_0 = arith.constant 0 : i32
    %c0_i32_1 = arith.constant 0 : i32
    return %c0_i32, %c0_i32_0 : i32, i32
  }
  func.func @transform_2(%arg0: i32) -> (i32, i32) {
    %c0_i32 = arith.constant 0 : i32
    %c0_i32_0 = arith.constant 0 : i32
    %c0_i32_1 = arith.constant 0 : i32
    return %c0_i32, %c0_i32_0 : i32, i32
  }
  func.func @transform_3(%arg0: i32) -> (i32, i32) {
    %c0_i32 = arith.constant 0 : i32
    %c0_i32_0 = arith.constant 0 : i32
    return %arg0, %c0_i32 : i32, i32
  }
}

</mosaic_0001>

<bundles_post_ra>
// kernel: tpu_custom_call.1
= control target key start
LH: loop header
LB: loop body
LE: loop exit
PB: predicated region body
PF: predicated region fallthrough
CT: control target
= control target key end

     0   :  { %8 = vsyncpa [#allocation3], 0  ;;  %s243_s0 = inlined_call_operand.hbm [shape: f32[8,128], index: 0, kind: input, shape index: {}]   ;;  %s244_s1 = inlined_call_operand.hbm [shape: f32[128,128], index: 1, kind: input, shape index: {}]   ;;  %s245_s2 = inlined_call_operand.vmem [shape: f32[1,128], index: 2, kind: input, shape index: {}]   ;;  %s246_s3 = inlined_call_operand.hbm [shape: f32[8,128], index: 3, kind: output, shape index: {}]  }
   0x1   :  { %9 = vsyncpa [#allocation6], 0 }
   0x2   :  { %10 = vsyncpa [#allocation4], 0  ;;  %s16_s14 = sshll.u32 %s243_s0, 4  ;;  %s206_s15 = smov [#allocation2]   ;;  %s17_s14 = int_to_ptr.hbm [resolvable:$true] %s16_s14 }
   0x3   :  { %s18_s16 = sshll.u32 %s206_s15, 4  ;;  %s26_s19 = sshll.u32 %s244_s1, 4  ;;  %s19_s16 = int_to_ptr.vmem [resolvable:$true] %s18_s16  ;;  %s27_s19 = int_to_ptr.hbm [resolvable:$true] %s26_s19 }
   0x4   :  { %21 = dma.hbm_to_vmem [thread:$0]  %s17_s14, 128, %s19_s16, [#allocation3]  }
   0x5   :  { %s207_s20 = smov [#allocation5]   ;;  %s208_s22 = smov 128  }
   0x6   :  { %s28_s21 = sshll.u32 %s207_s20, 4  ;;  %s209_s23 = smov 8   ;;  %s29_s21 = int_to_ptr.vmem [resolvable:$true] %s28_s21 }
   0x7   :  { %34 = dma.hbm_to_vmem [thread:$0]  %s27_s19, 2048, %s29_s21, [#allocation6], %s208_s22, %s208_s22, %s209_s23  }
   0x8   :  { %200 = dma.done.wait [#allocation3], 128  }
   0x9   :  { %201 = vsyncadd [#allocation3], 4294967168 }
   0xa   :  { %202 = dma.done.wait [#allocation6], 2048  }
   0xb   :  { %203 = vsyncadd [#allocation6], 4294965248  ;;  %v61_v0 = vld [vmem:[#allocation5 + $0x78] sm:$0xff]  ;;  %v60_v1 = vld [vmem:[#allocation5 + $0x70] sm:$0xff]  ;;  %s210_s24 = smov [#allocation7]  }
   0xc   :  { %66 = vmatpush.msra.mxu0 %v61_v0  ;;  %v59_v2 = vld [vmem:[#allocation5 + $0x68] sm:$0xff]  ;;  %v58_v3 = vld [vmem:[#allocation5 + $0x60] sm:$0xff]  ;;  %v57_v4 = vld [vmem:[#allocation5 + $0x58] sm:$0xff]  ;;  %s107_s25 = sshll.u32 %s210_s24, 4  ;;  %s108_s25 = int_to_ptr.vmem [resolvable:$true] %s107_s25 }
   0xd   :  { %v56_v5 = vld [vmem:[#allocation5 + $0x50] sm:$0xff]  ;;  %v55_v6 = vld [vmem:[#allocation5 + $0x48] sm:$0xff]  ;;  %v54_v7 = vld [vmem:[#allocation5 + $0x40] sm:$0xff] }
   0xe   :  { %67 = vmatpush.msra.mxu0 %v60_v1  ;;  %v53_v8 = vld [vmem:[#allocation5 + $0x38] sm:$0xff]  ;;  %v52_v9 = vld [vmem:[#allocation5 + $0x30] sm:$0xff]  ;;  %v51_v10 = vld [vmem:[#allocation5 + $0x28] sm:$0xff] }
   0xf   :  { %v50_v11 = vld [vmem:[#allocation5 + $0x20] sm:$0xff]  ;;  %v49_v12 = vld [vmem:[#allocation5 + $0x18] sm:$0xff]  ;;  %v48_v13 = vld [vmem:[#allocation5 + $0x10] sm:$0xff] }
  0x10   :  { %68 = vmatpush.msra.mxu0 %v59_v2  ;;  %v47_v14 = vld [vmem:[#allocation5 + $0x8] sm:$0xff]  ;;  %v46_v15 = vld [vmem:[#allocation5] sm:$0xff]  ;;  %v45_v16 = vld [vmem:[#allocation2] sm:$0xff] }
  0x11   :  { %v125_v17 = vld [vmem:[%s245_s2] ss:$0 sm:$0xff]  ;;  %s109_s2 = sshll.u32 %s246_s3, 4  ;;  %s110_s2 = int_to_ptr.hbm [resolvable:$true] %s109_s2 }
  0x12   :  { %69 = vmatpush.msra.mxu0 %v58_v3 }
  0x14   :  { %70 = vmatpush.msra.mxu0 %v57_v4 }
  0x16   :  { %71 = vmatpush.msra.mxu0 %v56_v5 }
  0x18   :  { %72 = vmatpush.msra.mxu0 %v55_v6 }
  0x1a   :  { %73 = vmatpush.msra.mxu0 %v54_v7 }
  0x1c   :  { %74 = vmatpush.msra.mxu0 %v53_v8 }
  0x1e   :  { %75 = vmatpush.msra.mxu0 %v52_v9 }
  0x20   :  { %76 = vmatpush.msra.mxu0 %v51_v10 }
  0x22   :  { %77 = vmatpush.msra.mxu0 %v50_v11 }
  0x24   :  { %78 = vmatpush.msra.mxu0 %v49_v12 }
  0x26   :  { %79 = vmatpush.msra.mxu0 %v48_v13 }
  0x28   :  { %80 = vmatpush.msra.mxu0 %v47_v14 }
  0x2a   :  { %81 = vmatpush.msra.mxu0 %v46_v15 }
  0x2b   :  { %82 = vmatmul.f32.vlgmr.msra.gmra.mxu0 %v45_v16 }
  0xa8   :  { %v83_v18 = vpop.f32.mrf.mxu0 }
  0xa9   :  { %v84_v19 = vadd.f32 %v125_v17, %v83_v18 }
  0xab   :  { %v86_v20 = vmul.f32 %v84_v19, %v84_v19 }
  0xad   :  { %87 = vadd.xlane.f32.xlu0 %v86_v20 }
 0x120   :  { %v88_v21 = vpop.xlane.xlu0 %87 }
 0x121   :  { %v89_v22 = vadd.f32 1e-12, %v88_v21 }
 0x123   :  { %126 = vrsqrt.f32 %v89_v22  ;;  %vm96_vm1 = vweird.f32 %v89_v22 }
 0x129   :  { %v127_v23 = vpop.eup %126 }
 0x12a   :  { %v91_v24 = vmul.f32 %v127_v23, %v89_v22  ;;  %vm97_vm0 = vweird.f32 %v127_v23 }
 0x12b   :  { %vm98_vm2 = vmor %vm96_vm1, %vm97_vm0 }
 0x12c   :  { %v92_v25 = vmul.f32 %v127_v23, %v91_v24 }
 0x12e   :  { %v93_v26 = vmul.f32 0.5, %v92_v25 }
 0x130   :  { %v94_v27 = vsub.f32 1.5, %v93_v26 }
 0x132   :  { %v95_v28 = vmul.f32 %v127_v23, %v94_v27 }
 0x134   :  { %v99_v29 = vsel %vm98_vm2, %v127_v23, %v95_v28 }
 0x135   :  { %v100_v30 = vmul.f32 %v99_v29, %v84_v19 }
 0x137   :  { %101 = vst [vmem:[#allocation7] sm:$0xff] %v100_v30 }
 0x138   :  { %112 = dma.vmem_to_hbm [thread:$0]  %s108_s25, 128, %s110_s2, [#allocation4]  }
 0x139   :  { %204 = dma.done.wait [#allocation4], 128  }
 0x13a   :  { %205 = vsyncadd [#allocation4], 4294967168 }
 0x13b   :  { %117 = vsyncpa [#allocation3], 1 }
 0x13c   :  { %118 = vsyncpa [#allocation6], 1 }
 0x13d   :  { %119 = vsyncpa [#allocation4], 1 }

</bundles_post_ra>
